<compile_context>
chip_gen: v7x
topology: tpu7x:2x2x1
jax: 0.10.0
libtpu: 0.0.40
codegen_flags: <defaults>
</compile_context>

<pallas_src>
import functools

import jax
import jax.numpy as jnp
from jax.experimental import pallas as pl
from jax.experimental.pallas import tpu as pltpu


def _masked_weekday_kernel(x_ref, w_ref, b_ref, tgt_ref, out_ref, *,
                           n_total, tile_n, tiles_per_core):
    # x_ref:   (tn, E)       x tile (input dtype)
    # w_ref:   (8, E)        weight padded to 8 classes (row 7 = 0), resident
    # b_ref:   (8, 1)        f32 bias (b[7] = -1e9), resident
    # tgt_ref: (1, tn)       int32 targets, lane-dense
    # out_ref: (1, 8, 128)   f32 per-core accumulator (same block for every t)
    c = pl.program_id(0)
    t = pl.program_id(1)

    @pl.when(t == 0)
    def _init():
        out_ref[...] = jnp.zeros_like(out_ref)

    g = c * tiles_per_core + t            # logical tile index (may be a clamped duplicate)

    # Linear layer, classes-on-sublanes / rows-on-lanes: (8, E) x (tn, E)^T -> (8, tn).
    logits = jax.lax.dot_general(
        w_ref[...], x_ref[...],
        dimension_numbers=(((1,), (1,)), ((), ())),
        preferred_element_type=jnp.float32)
    logits = logits + b_ref[...]                                    # (8, tn)

    # Row validity (flattened batch*seq rows live on lanes).  Mask BEFORE the
    # exp so garbage from a partial last block cannot produce NaN/Inf.
    col = jax.lax.broadcasted_iota(jnp.int32, (1, tile_n), 1) + g * tile_n
    valid = col < n_total                                           # (1, tn)
    logits = jnp.where(valid, logits, 0.0)

    # Numerically stable log-sum-exp over the class (sublane) axis.
    m = jnp.max(logits, axis=0, keepdims=True)                      # (1, tn)
    lse = jnp.log(jnp.sum(jnp.exp(logits - m), axis=0, keepdims=True)) + m

    # Target logit via sublane-iota one-hot (targets are 0..6, never class 7).
    cls = jax.lax.broadcasted_iota(jnp.int32, (8, tile_n), 0)
    onehot = (cls == tgt_ref[...]).astype(jnp.float32)              # (8, tn)
    tgt_logit = jnp.sum(logits * onehot, axis=0, keepdims=True)     # (1, tn)

    partial = jnp.sum(jnp.where(valid, lse - tgt_logit, 0.0))       # scalar
    out_ref[...] = out_ref[...] + partial                           # broadcast accumulate


def masked_weekday_loss(x, weight, bias, origin_weekday, *, tile_rows=None,
                        vmem_limit_bytes=48 * 1024 * 1024):
    """x: (B, S, E) f32 or bf16; weight: (7, E); bias: (7,); origin_weekday: (B, S) int.

    Returns the scalar mean cross-entropy loss (eval-mode dropout = identity).
    """
    B, S, E = x.shape
    N = B * S
    in_dtype = x.dtype                       # consume x as-is: no extra cast pass over HBM
    itemsize = jnp.dtype(in_dtype).itemsize

    x_flat = x.reshape(N, E)                 # metadata-only reshape
    w8 = jnp.zeros((8, E), in_dtype).at[:7, :].set(weight.astype(in_dtype))
    b8 = jnp.full((8, 1), -1e9, jnp.float32).at[:7, 0].set(bias.astype(jnp.float32))
    tgt = origin_weekday.reshape(1, N).astype(jnp.int32)

    LANE = 128
    if N < LANE:
        # Tiny problem: a single exact block; pad x's (tiny) row dim to a sublane multiple.
        tn = ((N + 7) // 8) * 8
        if tn != N:
            x_flat = jnp.pad(x_flat, ((0, tn - N), (0, 0)))
        num_tiles = 1
    else:
        if tile_rows is not None:
            tn = max(LANE, (int(tile_rows) // LANE) * LANE)
        else:
            # Honest VMEM accounting: double-buffered lane-padded x tile plus the
            # f32 (8, tn)-shaped tail temporaries, targeting ~half the VMEM limit.
            e_pad = ((E + LANE - 1) // LANE) * LANE
            bytes_per_row = 2 * e_pad * itemsize + 16 * 8 * 4
            tn = (vmem_limit_bytes // 2) // bytes_per_row
        tn = max(LANE, min((tn // LANE) * LANE, (N // LANE) * LANE))
        num_tiles = -(-N // tn)              # partial last block handled by in-kernel mask

    num_cores = 2 if num_tiles >= 2 else 1   # v7x has 2 TCs; harmless extra axis elsewhere
    tpc = -(-num_tiles // num_cores)

    padded = num_tiles * tn
    if padded != tgt.shape[1]:
        tgt = jnp.pad(tgt, ((0, 0), (0, padded - tgt.shape[1])))    # tiny int32 pad only

    last = num_tiles - 1

    def x_map(c, t):        # clamp spare steps (c*tpc + t >= num_tiles) onto a valid block
        return (jnp.minimum(c * tpc + t, last), 0)

    def tgt_map(c, t):
        return (0, jnp.minimum(c * tpc + t, last))

    kernel = functools.partial(_masked_weekday_kernel, n_total=N, tile_n=tn,
                               tiles_per_core=tpc)

    out = pl.pallas_call(
        kernel,
        out_shape=jax.ShapeDtypeStruct((num_cores, 8, 128), jnp.float32),
        grid_spec=pltpu.PrefetchScalarGridSpec(
            num_scalar_prefetch=0,
            grid=(num_cores, tpc),
            in_specs=[
                pl.BlockSpec((tn, E), x_map),               # x tile, pipelined over rows
                pl.BlockSpec((8, E), lambda c, t: (0, 0)),  # weight, resident
                pl.BlockSpec((8, 1), lambda c, t: (0, 0)),  # bias, resident
                pl.BlockSpec((1, tn), tgt_map),             # lane-dense targets tile
            ],
            out_specs=pl.BlockSpec((1, 8, 128), lambda c, t: (c, 0, 0)),
        ),
        compiler_params=pltpu.CompilerParams(
            dimension_semantics=("parallel", "arbitrary"),
            vmem_limit_bytes=vmem_limit_bytes,
        ),
    )(x_flat, w8, b8, tgt)

    # Tiny final reduction over per-core partials.
    return jnp.sum(out[:, 0, 0]) / jnp.float32(N)


def reference_loss(x, weight, bias, origin_weekday):
    B, S, E = x.shape
    logits = x.reshape(-1, E).astype(jnp.float32) @ weight.T.astype(jnp.float32) + bias
    tgt = origin_weekday.reshape(-1)
    logp = jax.nn.log_softmax(logits, axis=-1)
    return -jnp.mean(jnp.take_along_axis(logp, tgt[:, None], axis=-1))


if __name__ == "__main__":
    key = jax.random.PRNGKey(0)
    k_x, k_w, k_b, k_t, k_x2, k_t2 = jax.random.split(key, 6)

    # --- primary demo: (batch=2, seq_len=8, embed_size=32) ---
    batch, seq_len, embed_size = 2, 8, 32
    x = jax.random.normal(k_x, (batch, seq_len, embed_size), dtype=jnp.float32)

    bound = 1.0 / (embed_size ** 0.5)
    weight = jax.random.uniform(k_w, (7, embed_size), jnp.float32, -bound, bound)
    bias = jax.random.uniform(k_b, (7,), jnp.float32, -bound, bound)
    origin_weekday = jax.random.randint(k_t, (batch, seq_len), 0, 7, dtype=jnp.int32)

    loss = jax.block_until_ready(masked_weekday_loss(x, weight, bias, origin_weekday))
    ref = reference_loss(x, weight, bias, origin_weekday)
    assert jnp.allclose(loss, ref, atol=1e-5, rtol=1e-5), (loss, ref)

    # --- multi-tile / ragged / clamped-duplicate check: N=300 rows, 128-row tiles ---
    b2_, s2_ = 3, 100
    x2 = jax.random.normal(k_x2, (b2_, s2_, embed_size), dtype=jnp.float32)
    tgt2 = jax.random.randint(k_t2, (b2_, s2_), 0, 7, dtype=jnp.int32)
    loss2 = jax.block_until_ready(masked_weekday_loss(x2, weight, bias, tgt2, tile_rows=128))
    ref2 = reference_loss(x2, weight, bias, tgt2)
    assert jnp.allclose(loss2, ref2, atol=1e-5, rtol=1e-5), (loss2, ref2)

    # --- same inputs through the default (large-tile) heuristic path ---
    loss2b = jax.block_until_ready(masked_weekday_loss(x2, weight, bias, tgt2))
    assert jnp.allclose(loss2b, ref2, atol=1e-5, rtol=1e-5), (loss2b, ref2)

    # --- x already bf16 upstream: kernel consumes bf16 directly (no wrapper cast) ---
    x3 = x2.astype(jnp.bfloat16)
    loss3 = jax.block_until_ready(masked_weekday_loss(x3, weight, bias, tgt2, tile_rows=128))
    assert jnp.allclose(loss3, ref2, atol=3e-2, rtol=3e-2), (loss3, ref2)

    print("KERNEL_OK")
</pallas_src>

<mosaic_0001>
module attributes {stable_mosaic.version = 11 : i64} {
  func.func @_masked_weekday_kernel(%arg0: i32, %arg1: i32, %arg2: memref<16x32xf32, #tpu.memory_space<vmem>>, %arg3: memref<8x32xf32, #tpu.memory_space<vmem>>, %arg4: memref<8x1xf32, #tpu.memory_space<vmem>>, %arg5: memref<1x16xi32, #tpu.memory_space<vmem>>, %arg6: memref<1x8x128xf32, #tpu.memory_space<vmem>>) attributes {dimension_semantics = [#tpu.dimension_semantics<parallel>, #tpu.dimension_semantics<arbitrary>], iteration_bounds = array<i64: 1, 1>, scalar_prefetch = 0 : i64, scratch_operands = 0 : i64, tpu.core_type = #tpu.core_type<tc>, window_params = [{transform_indices = @transform_0, window_bounds = array<i64: 16, 32>}, {pipeline_mode = #tpu.pipeline_mode<synchronous>, transform_indices = @transform_1, window_bounds = array<i64: 8, 32>}, {pipeline_mode = #tpu.pipeline_mode<synchronous>, transform_indices = @transform_2, window_bounds = array<i64: 8, 1>}, {transform_indices = @transform_3, window_bounds = array<i64: 1, 16>}, {transform_indices = @transform_4, window_bounds = array<i64: 1, 8, 128>}]} {
    %c0_i32 = arith.constant 0 : i32
    %0 = arith.cmpi eq, %arg1, %c0_i32 : i32
    %1 = arith.extui %0 : i1 to i32
    %c0_i32_0 = arith.constant 0 : i32
    %2 = arith.cmpi ne, %1, %c0_i32_0 : i32
    scf.if %2 {
      %cst_21 = arith.constant 0.000000e+00 : f32
      %50 = vector.broadcast %cst_21 : f32 to vector<1x8x128xf32>
      %c0_22 = arith.constant 0 : index
      %c0_23 = arith.constant 0 : index
      %c0_24 = arith.constant 0 : index
      %51 = vector.load %arg6[%c0_22, %c0_23, %c0_24] : memref<1x8x128xf32, #tpu.memory_space<vmem>>, vector<1x8x128xf32>
      tpu.vector_store %arg6[%c0_22, %c0_23, %c0_24], %50 {strides = array<i32>} : memref<1x8x128xf32, #tpu.memory_space<vmem>>, vector<1x8x128xf32>,
    } else {
    }
    %c1_i32 = arith.constant 1 : i32
    %3 = arith.muli %arg0, %c1_i32 : i32
    %4 = arith.addi %3, %arg1 : i32
    %c0 = arith.constant 0 : index
    %c0_1 = arith.constant 0 : index
    %5 = vector.load %arg3[%c0, %c0_1] : memref<8x32xf32, #tpu.memory_space<vmem>>, vector<8x32xf32>
    %c0_2 = arith.constant 0 : index
    %c0_3 = arith.constant 0 : index
    %6 = vector.load %arg2[%c0_2, %c0_3] : memref<16x32xf32, #tpu.memory_space<vmem>>, vector<16x32xf32>
    %cst = arith.constant dense<0.000000e+00> : vector<8x16xf32>
    %7 = tpu.matmul %5, %6, %cst {dimension_numbers = #tpu.dot_dimension_numbers<[1], [1], [0], [0], [0, 0, 1, 0], [], []>} : vector<8x32xf32>, vector<16x32xf32>, vector<8x16xf32> -> vector<8x16xf32>
    %c0_4 = arith.constant 0 : index
    %c0_5 = arith.constant 0 : index
    %8 = vector.load %arg4[%c0_4, %c0_5] : memref<8x1xf32, #tpu.memory_space<vmem>>, vector<8x1xf32>
    %9 = vector.broadcast %8 : vector<8x1xf32> to vector<8x16xf32>
    %10 = arith.addf %7, %9 : vector<8x16xf32>
    %11 = tpu.iota {dimensions = array<i32: 1>} : vector<1x16xi32>
    %c16_i32 = arith.constant 16 : i32
    %12 = arith.muli %4, %c16_i32 : i32
    %13 = vector.broadcast %12 : i32 to vector<1x16xi32>
    %14 = arith.addi %11, %13 : vector<1x16xi32>
    %c16_i32_6 = arith.constant 16 : i32
    %15 = vector.broadcast %c16_i32_6 : i32 to vector<1x16xi32>
    %16 = arith.cmpi slt, %14, %15 : vector<1x16xi32>
    %cst_7 = arith.constant 0.000000e+00 : f32
    %17 = vector.shape_cast %16 : vector<1x16xi1> to vector<1x16xi1>
    %18 = vector.broadcast %17 : vector<1x16xi1> to vector<8x16xi1>
    %19 = vector.broadcast %cst_7 : f32 to vector<8x16xf32>
    %20 = arith.select %18, %10, %19 : vector<8x16xi1>, vector<8x16xf32>
    %cst_8 = arith.constant dense<0xFF800000> : vector<16xf32>
    %21 = vector.multi_reduction <maximumf>, %20, %cst_8 [0] : vector<8x16xf32> to vector<16xf32>
    %22 = vector.shape_cast %21 : vector<16xf32> to vector<1x16xf32>
    %23 = vector.broadcast %22 : vector<1x16xf32> to vector<8x16xf32>
    %24 = arith.subf %20, %23 : vector<8x16xf32>
    %25 = math.exp %24 : vector<8x16xf32>
    %cst_9 = arith.constant dense<0.000000e+00> : vector<16xf32>
    %26 = vector.multi_reduction <add>, %25, %cst_9 [0] : vector<8x16xf32> to vector<16xf32>
    %27 = vector.shape_cast %26 : vector<16xf32> to vector<1x16xf32>
    %28 = math.log %27 : vector<1x16xf32>
    %29 = arith.addf %28, %22 : vector<1x16xf32>
    %30 = tpu.iota {dimensions = array<i32: 0>} : vector<8x16xi32>
    %c0_10 = arith.constant 0 : index
    %c0_11 = arith.constant 0 : index
    %31 = vector.load %arg5[%c0_10, %c0_11] : memref<1x16xi32, #tpu.memory_space<vmem>>, vector<1x16xi32>
    %32 = vector.broadcast %31 : vector<1x16xi32> to vector<8x16xi32>
    %33 = arith.cmpi eq, %30, %32 : vector<8x16xi32>
    %34 = arith.extui %33 : vector<8x16xi1> to vector<8x16xi32>
    %35 = arith.sitofp %34 : vector<8x16xi32> to vector<8x16xf32>
    %36 = arith.mulf %20, %35 : vector<8x16xf32>
    %cst_12 = arith.constant dense<0.000000e+00> : vector<16xf32>
    %37 = vector.multi_reduction <add>, %36, %cst_12 [0] : vector<8x16xf32> to vector<16xf32>
    %38 = vector.shape_cast %37 : vector<16xf32> to vector<1x16xf32>
    %39 = arith.subf %29, %38 : vector<1x16xf32>
    %cst_13 = arith.constant 0.000000e+00 : f32
    %40 = vector.broadcast %cst_13 : f32 to vector<1x16xf32>
    %41 = arith.select %16, %39, %40 : vector<1x16xi1>, vector<1x16xf32>
    %42 = vector.shape_cast %41 : vector<1x16xf32> to vector<1x1x16xf32>
    %cst_14 = arith.constant dense<0.000000e+00> : vector<1xf32>
    %43 = vector.multi_reduction <add>, %42, %cst_14 [1, 2] : vector<1x1x16xf32> to vector<1xf32>
    %44 = vector.shape_cast %43 : vector<1xf32> to vector<1x1x1xf32>
    %45 = vector.extract %44[0, 0, 0] : f32 from vector<1x1x1xf32>
    %c0_15 = arith.constant 0 : index
    %c0_16 = arith.constant 0 : index
    %c0_17 = arith.constant 0 : index
    %46 = vector.load %arg6[%c0_15, %c0_16, %c0_17] : memref<1x8x128xf32, #tpu.memory_space<vmem>>, vector<1x8x128xf32>
    %47 = vector.broadcast %45 : f32 to vector<1x8x128xf32>
    %48 = arith.addf %46, %47 : vector<1x8x128xf32>
    %c0_18 = arith.constant 0 : index
    %c0_19 = arith.constant 0 : index
    %c0_20 = arith.constant 0 : index
    %49 = vector.load %arg6[%c0_18, %c0_19, %c0_20] : memref<1x8x128xf32, #tpu.memory_space<vmem>>, vector<1x8x128xf32>
    tpu.vector_store %arg6[%c0_18, %c0_19, %c0_20], %48 {strides = array<i32>} : memref<1x8x128xf32, #tpu.memory_space<vmem>>, vector<1x8x128xf32>,
    return
  }
  func.func @transform_0(%arg0: i32, %arg1: i32) -> (i32, i32) {
    %c1_i32 = arith.constant 1 : i32
    %0 = arith.muli %arg0, %c1_i32 : i32
    %1 = arith.addi %0, %arg1 : i32
    %c0_i32 = arith.constant 0 : i32
    %2 = arith.minsi %1, %c0_i32 : i32
    %c0_i32_0 = arith.constant 0 : i32
    %c0_i32_1 = arith.constant 0 : i32
    return %2, %c0_i32_0 : i32, i32
  }
  func.func @transform_1(%arg0: i32, %arg1: i32) -> (i32, i32) {
    %c0_i32 = arith.constant 0 : i32
    %c0_i32_0 = arith.constant 0 : i32
    %c0_i32_1 = arith.constant 0 : i32
    return %c0_i32, %c0_i32_0 : i32, i32
  }
  func.func @transform_2(%arg0: i32, %arg1: i32) -> (i32, i32) {
    %c0_i32 = arith.constant 0 : i32
    %c0_i32_0 = arith.constant 0 : i32
    %c0_i32_1 = arith.constant 0 : i32
    return %c0_i32, %c0_i32_0 : i32, i32
  }
  func.func @transform_3(%arg0: i32, %arg1: i32) -> (i32, i32) {
    %c1_i32 = arith.constant 1 : i32
    %0 = arith.muli %arg0, %c1_i32 : i32
    %1 = arith.addi %0, %arg1 : i32
    %c0_i32 = arith.constant 0 : i32
    %2 = arith.minsi %1, %c0_i32 : i32
    %c0_i32_0 = arith.constant 0 : i32
    %c0_i32_1 = arith.constant 0 : i32
    return %c0_i32_0, %2 : i32, i32
  }
  func.func @transform_4(%arg0: i32, %arg1: i32) -> (i32, i32, i32) {
    %c0_i32 = arith.constant 0 : i32
    %c0_i32_0 = arith.constant 0 : i32
    %c0_i32_1 = arith.constant 0 : i32
    return %arg0, %c0_i32, %c0_i32_0 : i32, i32, i32
  }
}

</mosaic_0001>

<bundles_post_ra>
// kernel: tpu_custom_call.1
= control target key start
LH: loop header
LB: loop body
LE: loop exit
PB: predicated region body
PF: predicated region fallthrough
CT: control target
= control target key end

     0   :  { %9 = vsyncpa [#allocation3], 0  ;;  %s399_s0 = inlined_call_operand.hbm [shape: f32[16,32], index: 0, kind: input, shape index: {}]   ;;  %s400_s1 = inlined_call_operand.vmem [shape: f32[8,32], index: 1, kind: input, shape index: {}]   ;;  %s401_s2 = inlined_call_operand.vmem [shape: f32[8,1], index: 2, kind: input, shape index: {}]   ;;  %s402_s3 = inlined_call_operand.vmem [shape: s32[1,16], index: 3, kind: input, shape index: {}]   ;;  %s403_s4 = inlined_call_operand.hbm [shape: f32[1,8,128], index: 4, kind: output, shape index: {}]  }
   0x1   :  { %10 = vsyncpa [#allocation4], 0  ;;  %s328_s15 = smov [#allocation2]   ;;  %s280_s19 = scalar_lea.hbm %s399_s0, 256 }
   0x2   :  { %s22_s16 = sshll.u32 %s328_s15, 4  ;;  %p281_p0 = scmp.ne.s32.totalorder %s399_s0, %s280_s19  ;;  %s23_s16 = int_to_ptr.vmem [resolvable:$true] %s22_s16 }
   0x3   :  { %p284_p1 = scmp.lt.u32.totalorder %s280_s19, %s399_s0 }
   0x5   :  { %p286_p2 = pnand %p284_p1, %p281_p0 }
   0x7   :  { %289 = shalt.err (!%p286_p2)
}
   0x8   :  { %s290_s24 = scalar_lea.vmem %s23_s16, 256  ;;  %p295_p4 = scmp.lt.s32.totalorder %s23_s16, %s23_s16 }
   0x9   :  { %p291_p3 = scmp.ne.s32.totalorder %s23_s16, %s290_s24  ;;  %p296_p5 = scmp.lt.s32.totalorder %s290_s24, %s290_s24 }
   0xb   :  { %p297_p6 = por %p296_p5, %p295_p4 }
   0xd   :  { %p298_p7 = pnand %p297_p6, %p291_p3 }
   0xf   :  { %301 = shalt.err (!%p298_p7)
}
  0x10   :  { %s329_s25 = smov 128   ;;  %s330_s26 = smov 8  }
  0x11   :  { %28 = dma.hbm_to_vmem [thread:$0]  %s399_s0, 256, %s23_s16, [#allocation3], %s329_s25, %s329_s25, %s330_s26  }
  0x12   :  { %324 = dma.done.wait [#allocation3], 256  }
  0x13   :  { %325 = vsyncadd [#allocation3], 4294967040  ;;  %v331_v0 = vmov 0.0|0.0   ;;  %vm332_vm0 = vmmov 0   ;;  %v333_v1 = vmov 0.0   ;;  %v334_v2 = vmov 0  }
  0x14   :  { %261 = vmatprep.subr.bf16.mxu0 %v331_v0  ;;  %258 = vmatprep.mubr.msk.f32.mxu0 %vm332_vm0, %v333_v1  ;;  %vm81_vm1 = vcmask 261120   ;;  %v73_v3 = vld [vmem:[#allocation2] sm:$0xff]  ;;  %v74_v4 = vld [vmem:[#allocation2 + $0x8] sm:$0xff]  ;;  %v161_v8 = vlaneseq  ;;  %vm170_vm4 = vcmask 130048   ;;  %vm211_vm6 = vcmask 122880  }
  0x15   :  { %275 = vset.pattern.permute.xlu0 %v334_v2  ;;  %vm263_vm2 = vmpackc.low %vm81_vm1, %vm81_vm1  ;;  %v262_v5 = vpack.c.bf16 %v74_v4, %v73_v3  ;;  %v75_v6 = vld [vmem:[%s401_s2] sm:$0xff] }
  0x16   :  { %78 = vperm.xlu0 %275, %v75_v6   ;;  %v72_v7 = vld [vmem:[%s400_s1] sm:$0xff]  ;;  %v162_v9 = vand.u32 127, %v161_v8  ;;  %v192_v24 = vshrl.u32 %v161_v8, 7 }
  0x17   :  { %264 = vmatpush3.bf16.xpose.msk.msra.mxu0 %vm263_vm2, %v262_v5  ;;  %v249_v25 = vld [vmem:[%s402_s3] ss:$0 sm:$0xff]  ;;  %s335_s3 = smov [#allocation5]  }
  0x18   :  { %vm166_vm3 = vcmp.lt.s32.totalorder %v162_v9, 16  ;;  %vm198_vm5 = vcmp.eq.s32.totalorder %v192_v24, %v249_v25  ;;  %s232_s6 = sshll.u32 %s335_s3, 4  ;;  %s233_s6 = int_to_ptr.vmem [resolvable:$true] %s232_s6 }
  0x19   :  { %v250_v26 = vsel %vm198_vm5, 1.0, %v333_v1  ;;  %s302_s8 = scalar_lea.vmem %s233_s6, 128  ;;  %p307_p9 = scmp.lt.s32.totalorder %s233_s6, %s233_s6 }
  0x1a   :  { %p303_p8 = scmp.ne.s32.totalorder %s233_s6, %s302_s8  ;;  %p308_p10 = scmp.lt.s32.totalorder %s302_s8, %s302_s8 }
  0x1c   :  { %p309_p11 = por %p308_p10, %p307_p9 }
  0x1e   :  { %259 = vmatmul.mubr.msk.f32.vlgmr.msra.gmra.mrb[0].mxu0 %vm81_vm1, %v72_v7  ;;  %p310_p12 = pnand %p309_p11, %p303_p8 }
  0x95   :  { %v79_v10 = vpop.permute.xlu0 %78 }
  0xf1   :  { %v157_v11 = vpop.f32.mrb[0].mxu0 }
  0xf2   :  { %v158_v12 = vadd.f32 %v157_v11, %v79_v10  ;;  %v260_v13 = vpop.f32.mrb[1].mxu0 }
  0xf4   :  { %v169_v14 = vsel %vm166_vm3, %v158_v12, 0.0 }
  0xf5   :  { %v171_v15 = vsel %vm170_vm4, %v169_v14, -inf  ;;  %v201_v28 = vmul.f32 %v250_v26, %v169_v14 }
  0xf6   :  { %v172_v16 = vrot.slane %v171_v15, 4 }
  0xf7   :  { %v202_v32 = vsel %vm170_vm4, %v201_v28, 0.0 }
  0xf8   :  { %v173_v17 = vmax.f32 %v171_v15, %v172_v16  ;;  %v203_v34 = vrot.slane %v202_v32, 4 }
  0xfa   :  { %v174_v18 = vrot.slane %v173_v17, 2  ;;  %v204_v37 = vadd.f32 %v203_v34, %v202_v32 }
  0xfc   :  { %v175_v19 = vmax.f32 %v173_v17, %v174_v18  ;;  %v205_v39 = vrot.slane %v204_v37, 2 }
  0xfe   :  { %v176_v20 = vrot.slane %v175_v19, 1  ;;  %v206_v40 = vadd.f32 %v205_v39, %v204_v37 }
 0x100   :  { %v177_v21 = vmax.f32 %v175_v19, %v176_v20  ;;  %v207_v41 = vrot.slane %v206_v40, 1 }
 0x102   :  { %v178_v22 = vsub.f32 %v169_v14, %v177_v21  ;;  %v208_v45 = vadd.f32 %v207_v41, %v206_v40 }
 0x104   :  { %v179_v23 = vmul.f32 1.442695, %v178_v22 }
 0x106   :  { %276 = vpow2.f32 %v179_v23 }
 0x110   :  { %v277_v27 = vpop.eup %276 }
 0x111   :  { %v181_v29 = vsel %vm170_vm4, %v277_v27, 0.0 }
 0x112   :  { %v182_v30 = vrot.slane %v181_v29, 4 }
 0x114   :  { %v183_v31 = vadd.f32 %v182_v30, %v181_v29 }
 0x116   :  { %v184_v33 = vrot.slane %v183_v31, 2 }
 0x118   :  { %v185_v35 = vadd.f32 %v184_v33, %v183_v31 }
 0x11a   :  { %v186_v36 = vrot.slane %v185_v35, 1 }
 0x11c   :  { %v187_v38 = vadd.f32 %v186_v36, %v185_v35 }
 0x11e   :  { %278 = vlog2.f32 %v187_v38 }
 0x128   :  { %v279_v42 = vpop.eup %278 }
 0x129   :  { %v189_v43 = vmul.f32 0.6931472, %v279_v42 }
 0x12b   :  { %v190_v44 = vadd.f32 %v189_v43, %v177_v21 }
 0x12d   :  { %v209_v46 = vsub.f32 %v190_v44, %v208_v45 }
 0x12f   :  { %v210_v47 = vsel %vm166_vm3, %v209_v46, 0.0 }
 0x130   :  { %v212_v48 = vsel %vm211_vm6, %v210_v47, 0.0 }
 0x131   :  { %213 = vadd.xlane.f32.xlu0 %v212_v48 }
 0x1be   :  { %v214_v49 = vpop.xlane.xlu0 %213 }
 0x1bf   :  { %v215_v50 = vrot.slane %v214_v49, 4 }
 0x1c1   :  { %v216_v51 = vadd.f32 %v215_v50, %v214_v49 }
 0x1c3   :  { %v217_v52 = vrot.slane %v216_v51, 2 }
 0x1c5   :  { %v218_v53 = vadd.f32 %v217_v52, %v216_v51 }
 0x1c7   :  { %v219_v54 = vrot.slane %v218_v53, 1 }
 0x1c9   :  { %v220_v55 = vadd.f32 %v219_v54, %v218_v53 }
 0x1cb   :  { %265 = vpush %v220_v55 }
 0x1fc   :  { %s266_s7 = spop %265 }
 0x1fd   :  { %v223_v56 = vstv %s266_s7 }
 0x1fe   :  { %225 = vst [vmem:[#allocation5] sm:$0xff] %v223_v56 }
 0x1ff   :  { %313 = shalt.err (!%p310_p12)
}
 0x200   :  { %s314_s11 = scalar_lea.hbm %s403_s4, 128 }
 0x201   :  { %p315_p13 = scmp.ne.s32.totalorder %s403_s4, %s314_s11  ;;  %p318_p0 = scmp.lt.u32.totalorder %s314_s11, %s403_s4 }
 0x203   :  { %p320_p1 = pnand %p318_p0, %p315_p13 }
 0x205   :  { %323 = shalt.err (!%p320_p1)
}
 0x206   :  { %235 = dma.vmem_to_hbm [thread:$0]  %s233_s6, 128, %s403_s4, [#allocation4]  }
 0x207   :  { %326 = dma.done.wait [#allocation4], 128  }
 0x208   :  { %327 = vsyncadd [#allocation4], 4294967168 }
 0x209   :  { %239 = vsyncpa [#allocation3], 1 }
 0x20a   :  { %240 = vsyncpa [#allocation4], 1 }

</bundles_post_ra>
